<compile_context>
chip_gen: v6e
topology: v6e:2x2x1
jax: 0.10.0
libtpu: 0.0.40
codegen_flags: <defaults>
</compile_context>

<pallas_src>
import functools

import jax
import jax.numpy as jnp
from jax.experimental import pallas as pl
from jax.experimental.pallas import tpu as pltpu

H_PAD = 128  # hidden width padded to one full lane vector


def _round_up(x, m):
    return (x + m - 1) // m * m


def lyapunov_critic_kernel(x_ref, w1_ref, b1_ref, w2_ref, b2_ref,
                           w3_ref, b3_ref, o_ref):
    """One batch tile of: Linear->ReLU->Linear->ReLU->Linear->Sigmoid."""
    # x arrives f32; cast to bf16 in-kernel (free VPU work under MXU slack).
    x = x_ref[...].astype(jnp.bfloat16)                       # (TB, F)

    # Layer 1: bf16 MXU matmul, f32 accumulate, f32 bias + ReLU.
    h1 = jnp.dot(x, w1_ref[...], preferred_element_type=jnp.float32)
    h1 = jnp.maximum(h1 + b1_ref[...], 0.0)                   # (TB, 128) f32

    # Layer 2: same.
    h2 = jnp.dot(h1.astype(jnp.bfloat16), w2_ref[...],
                 preferred_element_type=jnp.float32)
    h2 = jnp.maximum(h2 + b2_ref[...], 0.0)                   # (TB, 128) f32

    # Output layer (N=1): keep it off the MXU.  VPU multiply against the
    # pre-transposed (1, 128) weight row + XLU lane-reduce; both units have
    # slack while the MXU is the binding slot.
    logits = jnp.sum(h2 * w3_ref[...], axis=-1, keepdims=True) + b3_ref[...]

    # Sigmoid: exp + exact reciprocal, both on the otherwise-idle EUP.
    o_ref[...] = pl.reciprocal(1.0 + jnp.exp(-logits), approx=False)


def prepare_params(params):
    """Zero-pad hidden width 64 -> 128 (exact) and cast MXU operands to bf16.

    Biases and the output-layer row (used on the VPU/XLU) stay f32.
    """
    w1, b1, w2, b2, w3, b3 = params
    f_in, h1 = w1.shape
    h2 = w2.shape[1]
    w1p = jnp.zeros((f_in, H_PAD), jnp.float32).at[:, :h1].set(w1)
    b1p = jnp.zeros((1, H_PAD), jnp.float32).at[:, :h1].set(b1)
    w2p = jnp.zeros((H_PAD, H_PAD), jnp.float32).at[:h1, :h2].set(w2)
    b2p = jnp.zeros((1, H_PAD), jnp.float32).at[:, :h2].set(b2)
    # Output weights pre-transposed to a (1, H_PAD) row for the lane-reduce.
    w3p = jnp.zeros((1, H_PAD), jnp.float32).at[0, :h2].set(w3[:, 0])
    return (w1p.astype(jnp.bfloat16), b1p,
            w2p.astype(jnp.bfloat16), b2p,
            w3p, b3.astype(jnp.float32))


def _choose_tiling(batch, tile_b):
    """Batch tile (multiple of 16) and padded batch it must divide."""
    b_pad = _round_up(batch, 16)          # bf16 sublane-native tiles
    if b_pad <= tile_b:
        if b_pad >= 32:
            # Keep >= 2 grid steps so the "parallel" batch axis can actually
            # be split across the two TensorCores on v7x.
            tb = _round_up(-(-b_pad // 2), 16)
        else:
            tb = b_pad
    else:
        tb = tile_b
    b_pad = _round_up(b_pad, tb)
    return tb, b_pad


@functools.partial(jax.jit, static_argnames=("tile_b",))
def lyapunov_critic_forward(x, packed_params, tile_b=2048):
    """x: (B, input_size) f32 -> (B,) f32 (matches .squeeze(-1))."""
    w1, b1, w2, b2, w3, b3 = packed_params
    B, F = x.shape
    tb, b_pad = _choose_tiling(B, tile_b)
    if b_pad != B:
        # Only the ragged remainder is padded; no wrapper-side dtype cast.
        x = jnp.pad(x, ((0, b_pad - B), (0, 0)))

    resident = lambda shape: pl.BlockSpec(shape, lambda i: (0, 0))

    weight_bytes = (w1.size * 2 + w2.size * 2 +
                    (b1.size + b2.size + w3.size + b3.size) * 4)
    cost = pl.CostEstimate(
        flops=2 * b_pad * (F * H_PAD + H_PAD * H_PAD + H_PAD),
        transcendentals=b_pad,
        bytes_accessed=b_pad * F * 4 + b_pad * 4 + weight_bytes)

    out = pl.pallas_call(
        lyapunov_critic_kernel,
        out_shape=jax.ShapeDtypeStruct((b_pad, 1), jnp.float32),
        grid=(b_pad // tb,),
        in_specs=[
            pl.BlockSpec((tb, F), lambda i: (i, 0)),   # x: streamed per tile
            resident(w1.shape), resident(b1.shape),    # weights/biases: DMA'd
            resident(w2.shape), resident(b2.shape),    # once, stay VMEM-
            resident(w3.shape), resident(b3.shape),    # resident
        ],
        out_specs=pl.BlockSpec((tb, 1), lambda i: (i, 0)),
        compiler_params=pltpu.CompilerParams(
            dimension_semantics=("parallel",)),        # megacore on v7x
        cost_estimate=cost,
    )(x, w1, b1, w2, b2, w3, b3)
    return out[:B, 0]  # squeeze(-1)


def init_params(key, input_size, hidden_sizes=(64, 64), output_size=1):
    """Deterministic uniform(-1/sqrt(fan_in), 1/sqrt(fan_in)) init (PyTorch-style)."""
    sizes = (input_size,) + tuple(hidden_sizes) + (output_size,)
    params = []
    for i in range(len(sizes) - 1):
        fan_in, fan_out = sizes[i], sizes[i + 1]
        key, kw, kb = jax.random.split(key, 3)
        bound = 1.0 / jnp.sqrt(float(fan_in))
        w = jax.random.uniform(kw, (fan_in, fan_out), jnp.float32, -bound, bound)
        b = jax.random.uniform(kb, (1, fan_out), jnp.float32, -bound, bound)
        params += [w, b]
    return tuple(params)


def reference_forward(x, params):
    """Plain-JAX f32 reference for correctness check."""
    w1, b1, w2, b2, w3, b3 = params
    h1 = jnp.maximum(x @ w1 + b1, 0.0)
    h2 = jnp.maximum(h1 @ w2 + b2, 0.0)
    return jax.nn.sigmoid(h2 @ w3 + b3)[:, 0]


# TODO(synk): forward_with_grad (autograd Jacobian) is a JAX-level transform
# (e.g. jax.jacfwd over this wrapper), not an in-kernel op; only forward() is
# kernelized here.

if __name__ == "__main__":
    key = jax.random.PRNGKey(0)
    k_x, k_p = jax.random.split(key)

    batch, input_size = 8, 16
    x = jax.random.normal(k_x, (batch, input_size), dtype=jnp.float32)
    params = init_params(k_p, input_size, hidden_sizes=(64, 64), output_size=1)
    packed = prepare_params(params)

    y = lyapunov_critic_forward(x, packed)
    jax.block_until_ready(y)

    y_ref = reference_forward(x, params)
    assert y.shape == (batch,)
    # bf16 layer-1/2 matmuls: compare to the f32 reference with a tolerance
    # that comfortably covers bf16 rounding on these magnitudes.
    assert jnp.allclose(y, y_ref, atol=2e-2, rtol=0.0), float(
        jnp.max(jnp.abs(y - y_ref)))

    print("KERNEL_OK")
</pallas_src>

<mosaic_0001>
module attributes {stable_mosaic.version = 11 : i64} {
  func.func @lyapunov_critic_kernel(%arg0: i32, %arg1: memref<16x16xf32, #tpu.memory_space<vmem>>, %arg2: memref<16x128xbf16, #tpu.memory_space<vmem>>, %arg3: memref<1x128xf32, #tpu.memory_space<vmem>>, %arg4: memref<128x128xbf16, #tpu.memory_space<vmem>>, %arg5: memref<1x128xf32, #tpu.memory_space<vmem>>, %arg6: memref<1x128xf32, #tpu.memory_space<vmem>>, %arg7: memref<1x1xf32, #tpu.memory_space<vmem>>, %arg8: memref<16x1xf32, #tpu.memory_space<vmem>>) attributes {dimension_semantics = [#tpu.dimension_semantics<parallel>], iteration_bounds = array<i64: 1>, scalar_prefetch = 0 : i64, scratch_operands = 0 : i64, tpu.core_type = #tpu.core_type<tc>, window_params = [{transform_indices = @transform_0, window_bounds = array<i64: 16, 16>}, {pipeline_mode = #tpu.pipeline_mode<synchronous>, transform_indices = @transform_1, window_bounds = array<i64: 16, 128>}, {pipeline_mode = #tpu.pipeline_mode<synchronous>, transform_indices = @transform_2, window_bounds = array<i64: 1, 128>}, {pipeline_mode = #tpu.pipeline_mode<synchronous>, transform_indices = @transform_3, window_bounds = array<i64: 128, 128>}, {pipeline_mode = #tpu.pipeline_mode<synchronous>, transform_indices = @transform_4, window_bounds = array<i64: 1, 128>}, {pipeline_mode = #tpu.pipeline_mode<synchronous>, transform_indices = @transform_5, window_bounds = array<i64: 1, 128>}, {pipeline_mode = #tpu.pipeline_mode<synchronous>, transform_indices = @transform_6, window_bounds = array<i64: 1, 1>}, {transform_indices = @transform_7, window_bounds = array<i64: 16, 1>}]} {
    %c0 = arith.constant 0 : index
    %c0_0 = arith.constant 0 : index
    %0 = vector.load %arg1[%c0, %c0_0] : memref<16x16xf32, #tpu.memory_space<vmem>>, vector<16x16xf32>
    %1 = arith.truncf %0 : vector<16x16xf32> to vector<16x16xbf16>
    %c0_1 = arith.constant 0 : index
    %c0_2 = arith.constant 0 : index
    %2 = vector.load %arg2[%c0_1, %c0_2] : memref<16x128xbf16, #tpu.memory_space<vmem>>, vector<16x128xbf16>
    %cst = arith.constant dense<0.000000e+00> : vector<16x128xf32>
    %3 = tpu.matmul %1, %2, %cst {dimension_numbers = #tpu.dot_dimension_numbers<[1], [0], [0], [1], [0, 0, 1, 1], [], []>} : vector<16x16xbf16>, vector<16x128xbf16>, vector<16x128xf32> -> vector<16x128xf32>
    %c0_3 = arith.constant 0 : index
    %c0_4 = arith.constant 0 : index
    %4 = vector.load %arg3[%c0_3, %c0_4] : memref<1x128xf32, #tpu.memory_space<vmem>>, vector<1x128xf32>
    %5 = vector.broadcast %4 : vector<1x128xf32> to vector<16x128xf32>
    %6 = arith.addf %3, %5 : vector<16x128xf32>
    %cst_5 = arith.constant 0.000000e+00 : f32
    %7 = vector.broadcast %cst_5 : f32 to vector<16x128xf32>
    %8 = arith.maximumf %6, %7 : vector<16x128xf32>
    %9 = arith.truncf %8 : vector<16x128xf32> to vector<16x128xbf16>
    %c0_6 = arith.constant 0 : index
    %c0_7 = arith.constant 0 : index
    %10 = vector.load %arg4[%c0_6, %c0_7] : memref<128x128xbf16, #tpu.memory_space<vmem>>, vector<128x128xbf16>
    %cst_8 = arith.constant dense<0.000000e+00> : vector<16x128xf32>
    %11 = tpu.matmul %9, %10, %cst_8 {dimension_numbers = #tpu.dot_dimension_numbers<[1], [0], [0], [1], [0, 0, 1, 1], [], []>} : vector<16x128xbf16>, vector<128x128xbf16>, vector<16x128xf32> -> vector<16x128xf32>
    %c0_9 = arith.constant 0 : index
    %c0_10 = arith.constant 0 : index
    %12 = vector.load %arg5[%c0_9, %c0_10] : memref<1x128xf32, #tpu.memory_space<vmem>>, vector<1x128xf32>
    %13 = vector.broadcast %12 : vector<1x128xf32> to vector<16x128xf32>
    %14 = arith.addf %11, %13 : vector<16x128xf32>
    %cst_11 = arith.constant 0.000000e+00 : f32
    %15 = vector.broadcast %cst_11 : f32 to vector<16x128xf32>
    %16 = arith.maximumf %14, %15 : vector<16x128xf32>
    %c0_12 = arith.constant 0 : index
    %c0_13 = arith.constant 0 : index
    %17 = vector.load %arg6[%c0_12, %c0_13] : memref<1x128xf32, #tpu.memory_space<vmem>>, vector<1x128xf32>
    %18 = vector.broadcast %17 : vector<1x128xf32> to vector<16x128xf32>
    %19 = arith.mulf %16, %18 : vector<16x128xf32>
    %cst_14 = arith.constant dense<0.000000e+00> : vector<16xf32>
    %20 = vector.multi_reduction <add>, %19, %cst_14 [1] : vector<16x128xf32> to vector<16xf32>
    %21 = vector.shape_cast %20 : vector<16xf32> to vector<16x1xf32>
    %c0_15 = arith.constant 0 : index
    %c0_16 = arith.constant 0 : index
    %22 = vector.load %arg7[%c0_15, %c0_16] : memref<1x1xf32, #tpu.memory_space<vmem>>, vector<1x1xf32>
    %23 = vector.broadcast %22 : vector<1x1xf32> to vector<16x1xf32>
    %24 = arith.addf %21, %23 : vector<16x1xf32>
    %cst_17 = arith.constant 0.000000e+00 : f32
    %25 = vector.broadcast %cst_17 : f32 to vector<16x1xf32>
    %26 = arith.subf %25, %24 : vector<16x1xf32>
    %27 = math.exp %26 : vector<16x1xf32>
    %cst_18 = arith.constant 1.000000e+00 : f32
    %28 = vector.broadcast %cst_18 : f32 to vector<16x1xf32>
    %29 = arith.addf %28, %27 : vector<16x1xf32>
    %30 = tpu.reciprocal %29 : vector<16x1xf32> -> vector<16x1xf32>
    %c0_19 = arith.constant 0 : index
    %c0_20 = arith.constant 0 : index
    %31 = vector.load %arg8[%c0_19, %c0_20] : memref<16x1xf32, #tpu.memory_space<vmem>>, vector<16x1xf32>
    tpu.vector_store %arg8[%c0_19, %c0_20], %30 {strides = array<i32>} : memref<16x1xf32, #tpu.memory_space<vmem>>, vector<16x1xf32>,
    return
  }
  func.func @transform_0(%arg0: i32) -> (i32, i32) {
    %c0_i32 = arith.constant 0 : i32
    %c0_i32_0 = arith.constant 0 : i32
    return %arg0, %c0_i32 : i32, i32
  }
  func.func @transform_1(%arg0: i32) -> (i32, i32) {
    %c0_i32 = arith.constant 0 : i32
    %c0_i32_0 = arith.constant 0 : i32
    %c0_i32_1 = arith.constant 0 : i32
    return %c0_i32, %c0_i32_0 : i32, i32
  }
  func.func @transform_2(%arg0: i32) -> (i32, i32) {
    %c0_i32 = arith.constant 0 : i32
    %c0_i32_0 = arith.constant 0 : i32
    %c0_i32_1 = arith.constant 0 : i32
    return %c0_i32, %c0_i32_0 : i32, i32
  }
  func.func @transform_3(%arg0: i32) -> (i32, i32) {
    %c0_i32 = arith.constant 0 : i32
    %c0_i32_0 = arith.constant 0 : i32
    %c0_i32_1 = arith.constant 0 : i32
    return %c0_i32, %c0_i32_0 : i32, i32
  }
  func.func @transform_4(%arg0: i32) -> (i32, i32) {
    %c0_i32 = arith.constant 0 : i32
    %c0_i32_0 = arith.constant 0 : i32
    %c0_i32_1 = arith.constant 0 : i32
    return %c0_i32, %c0_i32_0 : i32, i32
  }
  func.func @transform_5(%arg0: i32) -> (i32, i32) {
    %c0_i32 = arith.constant 0 : i32
    %c0_i32_0 = arith.constant 0 : i32
    %c0_i32_1 = arith.constant 0 : i32
    return %c0_i32, %c0_i32_0 : i32, i32
  }
  func.func @transform_6(%arg0: i32) -> (i32, i32) {
    %c0_i32 = arith.constant 0 : i32
    %c0_i32_0 = arith.constant 0 : i32
    %c0_i32_1 = arith.constant 0 : i32
    return %c0_i32, %c0_i32_0 : i32, i32
  }
  func.func @transform_7(%arg0: i32) -> (i32, i32) {
    %c0_i32 = arith.constant 0 : i32
    %c0_i32_0 = arith.constant 0 : i32
    return %arg0, %c0_i32 : i32, i32
  }
}

</mosaic_0001>

<bundles_post_ra>
// kernel: lyapunov_critic_forward.1
= control target key start
LH: loop header
LB: loop body
LE: loop exit
PB: predicated region body
PF: predicated region fallthrough
CT: control target
= control target key end

     0   :  { %s433_s0 = inlined_call_operand.vmem [shape: f32[16,16], index: 0, kind: input, shape index: {}]   ;;  %s434_s1 = inlined_call_operand.vmem [shape: bf16[16,128], index: 1, kind: input, shape index: {}]   ;;  %s435_s2 = inlined_call_operand.vmem [shape: f32[1,128], index: 2, kind: input, shape index: {}]   ;;  %s436_s3 = inlined_call_operand.hbm [shape: bf16[128,128], index: 3, kind: input, shape index: {}]   ;;  %s437_s4 = inlined_call_operand.vmem [shape: f32[1,128], index: 4, kind: input, shape index: {}]   ;;  %s438_s5 = inlined_call_operand.vmem [shape: f32[1,128], index: 5, kind: input, shape index: {}]   ;;  %s439_s6 = inlined_call_operand.<no memory space> [shape: f32[1,1], index: 6, kind: input, shape index: {}]   ;;  %s440_s7 = inlined_call_operand.vmem [shape: f32[16,1], index: 7, kind: output, shape index: {}]  }
   0x1   :  { %v12_v0 = vstv %s439_s6 }
   0x2   :  { %13 = vst [vmem:[#allocation2] sm:$0x1] %v12_v0 }
   0x3   :  { %14 = vsyncpa [#allocation4], 0  ;;  %s358_s26 = smov [#allocation3]  }
   0x4   :  { %s26_s27 = sshll.u32 %s358_s26, 4  ;;  %s27_s27 = int_to_ptr.vmem [resolvable:$true] %s26_s27 }
   0x5   :  { %s344_s28 = scalar_lea.vmem %s27_s27, 1024  ;;  %p349_p1 = scmp.lt.s32.totalorder %s27_s27, %s27_s27 }
   0x6   :  { %p345_p0 = scmp.ne.s32.totalorder %s27_s27, %s344_s28  ;;  %p350_p2 = scmp.lt.s32.totalorder %s344_s28, %s344_s28 }
   0x8   :  { %p351_p3 = por %p350_p2, %p349_p1 }
   0xa   :  { %p352_p4 = pnand %p351_p3, %p345_p0 }
   0xc   :  { %355 = shalt.err (!%p352_p4)
}
   0xd   :  { %s359_s29 = smov 64   ;;  %s360_s30 = smov 4  }
   0xe   :  { %32 = dma.hbm_to_vmem [thread:$0]  %s436_s3, 1024, %s27_s27, [#allocation4], %s359_s29, %s359_s29, %s360_s30  }
   0xf   :  { %356 = dma.done.wait [#allocation4], 1024  }
  0x10   :  { %357 = vsyncadd [#allocation4], 4294966272  ;;  %v361_v1 = vmov 0.0   ;;  %vm362_vm0 = vmmov 0   ;;  %v319_v2 = vld [vmem:[%s434_s1] sm:$0xff]   ;;  %v44_v4 = vld [vmem:[%s433_s0 + $0x8] sm:$0xff] }
  0x11   :  { %288 = vmatprep.subr.bf16.mxu0 %v361_v1  ;;  %290 = vmatprep.mubr.msk.bf16.mxu0 %vm362_vm0, %v361_v1  ;;  %v43_v3 = vld [vmem:[%s433_s0] sm:$0xff]  ;;  %vm61_vm1 = vcmask 130048   ;;  %v321_v7 = vld [vmem:[#allocation3 + $0x30] sm:$0xff]   ;;  %v322_v8 = vld [vmem:[#allocation3 + $0x28] sm:$0xff]   ;;  %vm255_vm2 = vcmask 7168  }
  0x12   :  { %294 = vmatprep.subr.bf16.mxu1 %v361_v1  ;;  %310 = vmatprep.mubr.msk.bf16.mxu1 %vm362_vm0, %v361_v1  ;;  %v45_v5 = vpack.c.bf16 %v44_v4, %v43_v3  ;;  %v320_v6 = vld [vmem:[#allocation3 + $0x38] sm:$0xff]   ;;  %v323_v9 = vld [vmem:[#allocation3 + $0x20] sm:$0xff]   ;;  %v325_v11 = vld [vmem:[#allocation3 + $0x10] sm:$0xff]  }
  0x13   :  { %289 = vmatpush3.bf16.msra.mxu0 %v319_v2  ;;  %295 = vmatpush3.bf16.msra.mxu1 %v320_v6  ;;  %v324_v10 = vld [vmem:[#allocation3 + $0x18] sm:$0xff]   ;;  %v326_v12 = vld [vmem:[#allocation3 + $0x8] sm:$0xff]   ;;  %v327_v13 = vld [vmem:[#allocation3] sm:$0xff]  }
  0x14   :  { %296 = vmatprep.subr.bf16.mxu1 %v361_v1  ;;  %v263_v14 = vld [vmem:[%s435_s2] ss:$0 sm:$0xff] }
  0x15   :  { %v266_v24 = vld [vmem:[%s437_s4] ss:$0 sm:$0xff] }
  0x16   :  { %291 = vmatmul.mubr.msk.bf16.vlgmr.msra.gmra.mxu0 %vm61_vm1, %v45_v5  ;;  %v275_v28 = vld [vmem:[%s438_s5] ss:$0 sm:$0xff] }
  0x17   :  { %297 = vmatpush3.bf16.msra.mxu1 %v321_v7  ;;  %v276_v36 = vld [vmem:[#allocation2] ss:$0 sm:$0xff] }
  0x18   :  { %298 = vmatprep.subr.bf16.mxu1 %v361_v1 }
  0x1b   :  { %299 = vmatpush3.bf16.msra.mxu1 %v322_v8 }
  0x1c   :  { %300 = vmatprep.subr.bf16.mxu1 %v361_v1 }
  0x1f   :  { %301 = vmatpush3.bf16.msra.mxu1 %v323_v9 }
  0x20   :  { %302 = vmatprep.subr.bf16.mxu1 %v361_v1 }
  0x23   :  { %303 = vmatpush3.bf16.msra.mxu1 %v324_v10 }
  0x24   :  { %304 = vmatprep.subr.bf16.mxu1 %v361_v1 }
  0x27   :  { %305 = vmatpush3.bf16.msra.mxu1 %v325_v11 }
  0x28   :  { %306 = vmatprep.subr.bf16.mxu1 %v361_v1 }
  0x2b   :  { %307 = vmatpush3.bf16.msra.mxu1 %v326_v12 }
  0x2c   :  { %308 = vmatprep.subr.bf16.mxu1 %v361_v1 }
  0x2f   :  { %309 = vmatpush3.bf16.msra.mxu1 %v327_v13 }
  0xd6   :  { %v99_v15 = vpop.f32.mrf.mxu0 }
  0xd7   :  { %v100_v17 = vadd.f32 %v263_v14, %v99_v15 }
  0xd8   :  { %v292_v16 = vpop.f32.mrf.mxu0 }
  0xd9   :  { %v106_v21 = vmax.f32 %v100_v17, 0.0 }
  0xda   :  { %v102_v18 = vpop.f32.mrf.mxu0 }
  0xdb   :  { %v103_v19 = vadd.f32 %v263_v14, %v102_v18 }
  0xdc   :  { %v293_v20 = vpop.f32.mrf.mxu0 }
  0xdd   :  { %v107_v22 = vmax.f32 %v103_v19, 0.0 }
  0xdf   :  { %v108_v23 = vpack.c.bf16 %v107_v22, %v106_v21 }
  0xe1   :  { %311 = vmatmul.mubr.bf16.vlgmr.msra.gmra.mxu1 %v108_v23 }
 0x1a1   :  { %v214_v25 = vpop.f32.mrf.mxu1 }
 0x1a2   :  { %v215_v26 = vadd.f32 %v266_v24, %v214_v25 }
 0x1a3   :  { %v312_v27 = vpop.f32.mrf.mxu1 }
 0x1a4   :  { %v221_v29 = vmax.f32 %v215_v26, 0.0 }
 0x1a5   :  { %v217_v30 = vpop.f32.mrf.mxu1 }
 0x1a6   :  { %v218_v31 = vadd.f32 %v266_v24, %v217_v30  ;;  %v230_v32 = vmul.f32 %v275_v28, %v221_v29 }
 0x1a7   :  { %v313_v33 = vpop.f32.mrf.mxu1 }
 0x1a8   :  { %v222_v34 = vmax.f32 %v218_v31, 0.0  ;;  %232 = vadd.xlane.f32.xlu0 %v230_v32 }
 0x1aa   :  { %v231_v35 = vmul.f32 %v275_v28, %v222_v34 }
 0x1ac   :  { %234 = vadd.xlane.f32.xlu0 %v231_v35 }
 0x231   :  { %v233_v37 = vpop.xlane.xlu0 %232 }
 0x232   :  { %v243_v38 = vadd.f32 %v276_v36, %v233_v37 }
 0x234   :  { %v245_v39 = vsub.f32 0.0, %v243_v38 }
 0x235   :  { %v235_v40 = vpop.xlane.xlu0 %234 }
 0x236   :  { %v247_v41 = vmul.f32 1.442695, %v245_v39  ;;  %v244_v42 = vadd.f32 %v276_v36, %v235_v40 }
 0x238   :  { %328 = vpow2.f32 %v247_v41  ;;  %v246_v43 = vsub.f32 0.0, %v244_v42 }
 0x23a   :  { %v249_v44 = vmul.f32 1.442695, %v246_v43 }
 0x23c   :  { %330 = vpow2.f32 %v249_v44 }
 0x245   :  { %v329_v45 = vpop.eup %328 }
 0x246   :  { %v251_v46 = vadd.f32 1.0, %v329_v45 }
 0x248   :  { %332 = vrcp.f32 %v251_v46 }
 0x249   :  { %v331_v47 = vpop.eup %330 }
 0x24a   :  { %v252_v48 = vadd.f32 1.0, %v331_v47 }
 0x24c   :  { %334 = vrcp.f32 %v252_v48 }
 0x255   :  { %v333_v49 = vpop.eup %332 }
 0x256   :  { %256 = vst.msk [vmem:[%s440_s7] sm:$0xff] %vm255_vm2, %v333_v49 }
 0x259   :  { %v335_v50 = vpop.eup %334 }
 0x25a   :  { %257 = vst.msk [vmem:[%s440_s7 + $0x8] sm:$0xff] %vm255_vm2, %v335_v50 }
 0x25b   :  { %262 = vsyncpa [#allocation4], 1 }

</bundles_post_ra>
